<compile_context>
chip_gen: v7x
topology: tpu7x:2x2x1
jax: 0.10.0
libtpu: 0.0.40
codegen_flags: <defaults>
</compile_context>

<pallas_src>
import jax
import jax.numpy as jnp
from jax.experimental import pallas as pl
from jax.experimental.pallas import tpu as pltpu

LANE = 128           # lane width
SUBLANE_BF16 = 16    # bf16 sublane packing -> batch tile must be a multiple of 16


def _round_up(x, m):
    return ((x + m - 1) // m) * m


def mlp_policy_kernel(x_ref, w1_ref, b1_ref, w2_ref, b2_ref, w3_ref, b3_ref, o_ref):
    # Layer 1: bf16 matmul, f32 accumulate, bias + ReLU in f32.
    h1 = jnp.dot(x_ref[...], w1_ref[...], preferred_element_type=jnp.float32)
    h1 = jnp.maximum(h1 + b1_ref[...], 0.0)
    # Layer 2.
    h2 = jnp.dot(h1.astype(w2_ref.dtype), w2_ref[...], preferred_element_type=jnp.float32)
    h2 = jnp.maximum(h2 + b2_ref[...], 0.0)
    # Output layer (lane-dense, padded to 128 cols) + tanh head.
    out = jnp.dot(h2.astype(w3_ref.dtype), w3_ref[...], preferred_element_type=jnp.float32)
    o_ref[...] = jnp.tanh(out + b3_ref[...]).astype(o_ref.dtype)


def deterministic_policy_forward(states, params, *, block_m=256):
    """states: (B, state_dim) f32. params: w1,b1,w2,b2,w3,b3 with w as (in, out)."""
    B, state_dim = states.shape
    H1, H2 = params["w2"].shape
    action_dim = params["w3"].shape[1]

    # Padded sizes: lane-dense K for layer 1, lane-dense output, sublane-aligned batch tile.
    K1p = _round_up(state_dim, LANE)
    Np = _round_up(action_dim, LANE)
    TM = min(block_m, _round_up(B, SUBLANE_BF16))
    Bp = _round_up(B, TM)

    cdt = jnp.bfloat16  # MXU operand dtype (accumulation stays f32)

    # Pad + cast inputs/weights; biases stay f32.
    x = jnp.zeros((Bp, K1p), dtype=cdt).at[:B, :state_dim].set(states.astype(cdt))
    w1 = jnp.zeros((K1p, H1), dtype=cdt).at[:state_dim, :].set(params["w1"].astype(cdt))
    w2 = params["w2"].astype(cdt)
    w3 = jnp.zeros((H2, Np), dtype=cdt).at[:, :action_dim].set(params["w3"].astype(cdt))
    b1 = params["b1"].reshape(1, H1).astype(jnp.float32)
    b2 = params["b2"].reshape(1, H2).astype(jnp.float32)
    b3 = (jnp.zeros((1, Np), jnp.float32)
          .at[:, :action_dim].set(params["b3"].reshape(1, action_dim).astype(jnp.float32)))

    grid = (Bp // TM,)

    flops = 2 * Bp * (K1p * H1 + H1 * H2 + H2 * Np)
    bytes_accessed = (
        Bp * K1p * 2                       # x (bf16)
        + (K1p * H1 + H1 * H2 + H2 * Np) * 2  # weights (bf16)
        + (H1 + H2 + Np) * 4               # biases (f32)
        + Bp * Np * 4                      # output (f32)
    )
    cost = pl.CostEstimate(flops=flops, transcendentals=Bp * Np,
                           bytes_accessed=bytes_accessed)

    const = lambda i: (0, 0)  # weights/biases: same block every grid step -> stay resident

    out_padded = pl.pallas_call(
        mlp_policy_kernel,
        out_shape=jax.ShapeDtypeStruct((Bp, Np), jnp.float32),
        grid=grid,
        in_specs=[
            pl.BlockSpec((TM, K1p), lambda i: (i, 0)),  # states: tiled over batch
            pl.BlockSpec((K1p, H1), const),
            pl.BlockSpec((1, H1), const),
            pl.BlockSpec((H1, H2), const),
            pl.BlockSpec((1, H2), const),
            pl.BlockSpec((H2, Np), const),
            pl.BlockSpec((1, Np), const),
        ],
        out_specs=pl.BlockSpec((TM, Np), lambda i: (i, 0)),
        compiler_params=pltpu.CompilerParams(dimension_semantics=("parallel",)),
        cost_estimate=cost,
    )(x, w1, b1, w2, b2, w3, b3)

    # Slice away batch/lane padding.
    return out_padded[:B, :action_dim]


def init_params(state_dim, action_dim, hidden_units=(256, 256), seed=0):
    """Deterministic synthetic initialization of the MLP parameters (w as (in, out))."""
    key = jax.random.PRNGKey(seed)
    dims = [state_dim, *hidden_units, action_dim]
    params = {}
    for i in range(len(dims) - 1):
        key, wk = jax.random.split(key)
        fan_in = dims[i]
        w = jax.random.normal(wk, (dims[i], dims[i + 1]), dtype=jnp.float32) / jnp.sqrt(fan_in)
        b = jnp.zeros((1, dims[i + 1]), dtype=jnp.float32)
        params[f"w{i + 1}"] = w
        params[f"b{i + 1}"] = b
    return params


def reference_forward(states, params):
    h1 = jnp.maximum(states @ params["w1"] + params["b1"], 0.0)
    h2 = jnp.maximum(h1 @ params["w2"] + params["b2"], 0.0)
    return jnp.tanh(h2 @ params["w3"] + params["b3"])


if __name__ == "__main__":
    batch = 8
    state_dim = 32      # state_shape[0]
    action_dim = 8      # action_shape[0]
    hidden_units = (256, 256)

    key = jax.random.PRNGKey(0)
    states = jax.random.normal(key, (batch, state_dim), dtype=jnp.float32)

    params = init_params(state_dim, action_dim, hidden_units, seed=0)

    actions = deterministic_policy_forward(states, params)
    actions = jax.block_until_ready(actions)

    ref = jax.block_until_ready(reference_forward(states, params))
    assert actions.shape == (batch, action_dim)
    # bf16 MXU operands (f32 accumulation) -> loosened tolerance vs pure-f32 reference.
    assert jnp.allclose(actions, ref, atol=2e-2, rtol=2e-2), "mismatch vs reference"

    print("KERNEL_OK")
</pallas_src>

<mosaic_0001>
module attributes {stable_mosaic.version = 11 : i64} {
  func.func @mlp_policy_kernel(%arg0: i32, %arg1: memref<16x128xbf16, #tpu.memory_space<vmem>>, %arg2: memref<128x256xbf16, #tpu.memory_space<vmem>>, %arg3: memref<1x256xf32, #tpu.memory_space<vmem>>, %arg4: memref<256x256xbf16, #tpu.memory_space<vmem>>, %arg5: memref<1x256xf32, #tpu.memory_space<vmem>>, %arg6: memref<256x128xbf16, #tpu.memory_space<vmem>>, %arg7: memref<1x128xf32, #tpu.memory_space<vmem>>, %arg8: memref<16x128xf32, #tpu.memory_space<vmem>>) attributes {dimension_semantics = [#tpu.dimension_semantics<parallel>], iteration_bounds = array<i64: 1>, scalar_prefetch = 0 : i64, scratch_operands = 0 : i64, tpu.core_type = #tpu.core_type<tc>, window_params = [{transform_indices = @transform_0, window_bounds = array<i64: 16, 128>}, {pipeline_mode = #tpu.pipeline_mode<synchronous>, transform_indices = @transform_1, window_bounds = array<i64: 128, 256>}, {pipeline_mode = #tpu.pipeline_mode<synchronous>, transform_indices = @transform_2, window_bounds = array<i64: 1, 256>}, {pipeline_mode = #tpu.pipeline_mode<synchronous>, transform_indices = @transform_3, window_bounds = array<i64: 256, 256>}, {pipeline_mode = #tpu.pipeline_mode<synchronous>, transform_indices = @transform_4, window_bounds = array<i64: 1, 256>}, {pipeline_mode = #tpu.pipeline_mode<synchronous>, transform_indices = @transform_5, window_bounds = array<i64: 256, 128>}, {pipeline_mode = #tpu.pipeline_mode<synchronous>, transform_indices = @transform_6, window_bounds = array<i64: 1, 128>}, {transform_indices = @transform_7, window_bounds = array<i64: 16, 128>}]} {
    %c0 = arith.constant 0 : index
    %c0_0 = arith.constant 0 : index
    %0 = vector.load %arg1[%c0, %c0_0] : memref<16x128xbf16, #tpu.memory_space<vmem>>, vector<16x128xbf16>
    %c0_1 = arith.constant 0 : index
    %c0_2 = arith.constant 0 : index
    %1 = vector.load %arg2[%c0_1, %c0_2] : memref<128x256xbf16, #tpu.memory_space<vmem>>, vector<128x256xbf16>
    %cst = arith.constant dense<0.000000e+00> : vector<16x256xf32>
    %2 = tpu.matmul %0, %1, %cst {dimension_numbers = #tpu.dot_dimension_numbers<[1], [0], [0], [1], [0, 0, 1, 1], [], []>} : vector<16x128xbf16>, vector<128x256xbf16>, vector<16x256xf32> -> vector<16x256xf32>
    %c0_3 = arith.constant 0 : index
    %c0_4 = arith.constant 0 : index
    %3 = vector.load %arg3[%c0_3, %c0_4] : memref<1x256xf32, #tpu.memory_space<vmem>>, vector<1x256xf32>
    %4 = vector.broadcast %3 : vector<1x256xf32> to vector<16x256xf32>
    %5 = arith.addf %2, %4 : vector<16x256xf32>
    %cst_5 = arith.constant 0.000000e+00 : f32
    %6 = vector.broadcast %cst_5 : f32 to vector<16x256xf32>
    %7 = arith.maximumf %5, %6 : vector<16x256xf32>
    %8 = arith.truncf %7 : vector<16x256xf32> to vector<16x256xbf16>
    %c0_6 = arith.constant 0 : index
    %c0_7 = arith.constant 0 : index
    %9 = vector.load %arg4[%c0_6, %c0_7] : memref<256x256xbf16, #tpu.memory_space<vmem>>, vector<256x256xbf16>
    %cst_8 = arith.constant dense<0.000000e+00> : vector<16x256xf32>
    %10 = tpu.matmul %8, %9, %cst_8 {dimension_numbers = #tpu.dot_dimension_numbers<[1], [0], [0], [1], [0, 0, 1, 1], [], []>} : vector<16x256xbf16>, vector<256x256xbf16>, vector<16x256xf32> -> vector<16x256xf32>
    %c0_9 = arith.constant 0 : index
    %c0_10 = arith.constant 0 : index
    %11 = vector.load %arg5[%c0_9, %c0_10] : memref<1x256xf32, #tpu.memory_space<vmem>>, vector<1x256xf32>
    %12 = vector.broadcast %11 : vector<1x256xf32> to vector<16x256xf32>
    %13 = arith.addf %10, %12 : vector<16x256xf32>
    %cst_11 = arith.constant 0.000000e+00 : f32
    %14 = vector.broadcast %cst_11 : f32 to vector<16x256xf32>
    %15 = arith.maximumf %13, %14 : vector<16x256xf32>
    %16 = arith.truncf %15 : vector<16x256xf32> to vector<16x256xbf16>
    %c0_12 = arith.constant 0 : index
    %c0_13 = arith.constant 0 : index
    %17 = vector.load %arg6[%c0_12, %c0_13] : memref<256x128xbf16, #tpu.memory_space<vmem>>, vector<256x128xbf16>
    %cst_14 = arith.constant dense<0.000000e+00> : vector<16x128xf32>
    %18 = tpu.matmul %16, %17, %cst_14 {dimension_numbers = #tpu.dot_dimension_numbers<[1], [0], [0], [1], [0, 0, 1, 1], [], []>} : vector<16x256xbf16>, vector<256x128xbf16>, vector<16x128xf32> -> vector<16x128xf32>
    %c0_15 = arith.constant 0 : index
    %c0_16 = arith.constant 0 : index
    %19 = vector.load %arg7[%c0_15, %c0_16] : memref<1x128xf32, #tpu.memory_space<vmem>>, vector<1x128xf32>
    %20 = vector.broadcast %19 : vector<1x128xf32> to vector<16x128xf32>
    %21 = arith.addf %18, %20 : vector<16x128xf32>
    %22 = math.tanh %21 : vector<16x128xf32>
    %c0_17 = arith.constant 0 : index
    %c0_18 = arith.constant 0 : index
    %23 = vector.load %arg8[%c0_17, %c0_18] : memref<16x128xf32, #tpu.memory_space<vmem>>, vector<16x128xf32>
    tpu.vector_store %arg8[%c0_17, %c0_18], %22 {strides = array<i32>} : memref<16x128xf32, #tpu.memory_space<vmem>>, vector<16x128xf32>,
    return
  }
  func.func @transform_0(%arg0: i32) -> (i32, i32) {
    %c0_i32 = arith.constant 0 : i32
    %c0_i32_0 = arith.constant 0 : i32
    return %arg0, %c0_i32 : i32, i32
  }
  func.func @transform_1(%arg0: i32) -> (i32, i32) {
    %c0_i32 = arith.constant 0 : i32
    %c0_i32_0 = arith.constant 0 : i32
    %c0_i32_1 = arith.constant 0 : i32
    return %c0_i32, %c0_i32_0 : i32, i32
  }
  func.func @transform_2(%arg0: i32) -> (i32, i32) {
    %c0_i32 = arith.constant 0 : i32
    %c0_i32_0 = arith.constant 0 : i32
    %c0_i32_1 = arith.constant 0 : i32
    return %c0_i32, %c0_i32_0 : i32, i32
  }
  func.func @transform_3(%arg0: i32) -> (i32, i32) {
    %c0_i32 = arith.constant 0 : i32
    %c0_i32_0 = arith.constant 0 : i32
    %c0_i32_1 = arith.constant 0 : i32
    return %c0_i32, %c0_i32_0 : i32, i32
  }
  func.func @transform_4(%arg0: i32) -> (i32, i32) {
    %c0_i32 = arith.constant 0 : i32
    %c0_i32_0 = arith.constant 0 : i32
    %c0_i32_1 = arith.constant 0 : i32
    return %c0_i32, %c0_i32_0 : i32, i32
  }
  func.func @transform_5(%arg0: i32) -> (i32, i32) {
    %c0_i32 = arith.constant 0 : i32
    %c0_i32_0 = arith.constant 0 : i32
    %c0_i32_1 = arith.constant 0 : i32
    return %c0_i32, %c0_i32_0 : i32, i32
  }
  func.func @transform_6(%arg0: i32) -> (i32, i32) {
    %c0_i32 = arith.constant 0 : i32
    %c0_i32_0 = arith.constant 0 : i32
    %c0_i32_1 = arith.constant 0 : i32
    return %c0_i32, %c0_i32_0 : i32, i32
  }
  func.func @transform_7(%arg0: i32) -> (i32, i32) {
    %c0_i32 = arith.constant 0 : i32
    %c0_i32_0 = arith.constant 0 : i32
    return %arg0, %c0_i32 : i32, i32
  }
}

</mosaic_0001>

<bundles_post_ra>
// kernel: tpu_custom_call.1
= control target key start
LH: loop header
LB: loop body
LE: loop exit
PB: predicated region body
PF: predicated region fallthrough
CT: control target
= control target key end

     0   :  { %12 = vsyncpa [#allocation3], 0  ;;  %s1150_s0 = inlined_call_operand.hbm [shape: bf16[16,128], index: 0, kind: input, shape index: {}]   ;;  %s1151_s1 = inlined_call_operand.hbm [shape: bf16[128,256], index: 1, kind: input, shape index: {}]   ;;  %s1152_s2 = inlined_call_operand.vmem [shape: f32[1,256], index: 2, kind: input, shape index: {}]   ;;  %s1153_s3 = inlined_call_operand.hbm [shape: bf16[256,256], index: 3, kind: input, shape index: {}]   ;;  %s1154_s4 = inlined_call_operand.vmem [shape: f32[1,256], index: 4, kind: input, shape index: {}]   ;;  %s1155_s5 = inlined_call_operand.hbm [shape: bf16[256,128], index: 5, kind: input, shape index: {}]   ;;  %s1156_s6 = inlined_call_operand.vmem [shape: f32[1,128], index: 6, kind: input, shape index: {}]   ;;  %s1157_s7 = inlined_call_operand.hbm [shape: f32[16,128], index: 7, kind: output, shape index: {}]  }
   0x1   :  { %13 = vsyncpa [#allocation6], 0 }
   0x2   :  { %14 = vsyncpa [#allocation9], 0 }
   0x3   :  { %15 = vsyncpa [#allocation4], 0  ;;  %s1009_s24 = smov [#allocation5]   ;;  %s891_s28 = scalar_lea.hbm %s1151_s1, 2048 }
   0x4   :  { %s33_s25 = sshll.u32 %s1009_s24, 4  ;;  %p892_p0 = scmp.ne.s32.totalorder %s1151_s1, %s891_s28  ;;  %s34_s25 = int_to_ptr.vmem [resolvable:$true] %s33_s25 }
   0x5   :  { %p895_p1 = scmp.lt.u32.totalorder %s891_s28, %s1151_s1 }
   0x7   :  { %p897_p2 = pnand %p895_p1, %p892_p0 }
   0x9   :  { %900 = shalt.err (!%p897_p2)
}
   0xa   :  { %s901_s10 = scalar_lea.vmem %s34_s25, 2048  ;;  %p906_p4 = scmp.lt.s32.totalorder %s34_s25, %s34_s25 }
   0xb   :  { %p902_p3 = scmp.ne.s32.totalorder %s34_s25, %s901_s10  ;;  %p907_p5 = scmp.lt.s32.totalorder %s901_s10, %s901_s10 }
   0xd   :  { %p908_p6 = por %p907_p5, %p906_p4 }
   0xf   :  { %p909_p7 = pnand %p908_p6, %p902_p3 }
  0x11   :  { %912 = shalt.err (!%p909_p7)
}
  0x12   :  { %s1010_s11 = smov 128   ;;  %s1011_s12 = smov 8  }
  0x13   :  { %39 = dma.hbm_to_vmem [thread:$0]  %s1151_s1, 2048, %s34_s25, [#allocation6], %s1010_s11, %s1010_s11, %s1011_s12  }
  0x14   :  { %s1012_s15 = smov [#allocation2]   ;;  %s913_s19 = scalar_lea.hbm %s1150_s0, 128 }
  0x15   :  { %s21_s16 = sshll.u32 %s1012_s15, 4  ;;  %p914_p8 = scmp.ne.s32.totalorder %s1150_s0, %s913_s19  ;;  %s22_s16 = int_to_ptr.vmem [resolvable:$true] %s21_s16 }
  0x16   :  { %p917_p9 = scmp.lt.u32.totalorder %s913_s19, %s1150_s0 }
  0x18   :  { %p919_p10 = pnand %p917_p9, %p914_p8 }
  0x1a   :  { %922 = shalt.err (!%p919_p10)
}
  0x1b   :  { %s923_s24 = scalar_lea.vmem %s22_s16, 128  ;;  %p928_p12 = scmp.lt.s32.totalorder %s22_s16, %s22_s16 }
  0x1c   :  { %p924_p11 = scmp.ne.s32.totalorder %s22_s16, %s923_s24  ;;  %p929_p13 = scmp.lt.s32.totalorder %s923_s24, %s923_s24 }
  0x1e   :  { %p930_p0 = por %p929_p13, %p928_p12 }
  0x20   :  { %p931_p1 = pnand %p930_p0, %p924_p11 }
  0x22   :  { %934 = shalt.err (!%p931_p1)
}
  0x23   :  { %s1013_s1 = smov 64   ;;  %s1014_s25 = smov 4  }
  0x24   :  { %27 = dma.hbm_to_vmem [thread:$0]  %s1150_s0, 128, %s22_s16, [#allocation3], %s1013_s1, %s1013_s1, %s1014_s25  }
  0x25   :  { %s1015_s28 = smov [#allocation7]   ;;  %s1016_s30 = smov [#allocation8]  }
  0x26   :  { %s47_s29 = sshll.u32 %s1015_s28, 4  ;;  %s61_s8 = sshll.u32 %s1016_s30, 4  ;;  %s48_s29 = int_to_ptr.vmem [resolvable:$true] %s47_s29  ;;  %s1089_s8 = int_to_ptr.vmem [resolvable:$true] %s61_s8 }
  0x27   :  { %s935_s13 = scalar_lea.hbm %s1153_s3, 4096 }
  0x28   :  { %p936_p2 = scmp.ne.s32.totalorder %s1153_s3, %s935_s13  ;;  %p939_p3 = scmp.lt.u32.totalorder %s935_s13, %s1153_s3 }
  0x2a   :  { %p941_p4 = pnand %p939_p3, %p936_p2 }
  0x2c   :  { %944 = shalt.err (!%p941_p4)
}
  0x2d   :  { %s945_s0 = scalar_lea.vmem %s48_s29, 4096  ;;  %p950_p6 = scmp.lt.s32.totalorder %s48_s29, %s48_s29 }
  0x2e   :  { %p946_p5 = scmp.ne.s32.totalorder %s48_s29, %s945_s0  ;;  %p951_p7 = scmp.lt.s32.totalorder %s945_s0, %s945_s0 }
  0x30   :  { %p952_p8 = por %p951_p7, %p950_p6 }
  0x32   :  { %p953_p9 = pnand %p952_p8, %p946_p5 }
  0x34   :  { %956 = shalt.err (!%p953_p9)
}
  0x35   :  { %53 = dma.hbm_to_vmem [thread:$0]  %s1153_s3, 4096, %s48_s29, [#allocation6], %s1010_s11, %s1010_s11, %s1011_s12  }
  0x36   :  { %s957_s22 = scalar_lea.hbm %s1155_s5, 2048 }
  0x37   :  { %p958_p10 = scmp.ne.s32.totalorder %s1155_s5, %s957_s22  ;;  %p961_p11 = scmp.lt.u32.totalorder %s957_s22, %s1155_s5 }
  0x39   :  { %p963_p12 = pnand %p961_p11, %p958_p10 }
  0x3b   :  { %966 = shalt.err (!%p963_p12)
}
  0x3c   :  { %s967_s28 = scalar_lea.vmem %s1089_s8, 2048  ;;  %p972_p0 = scmp.lt.s32.totalorder %s1089_s8, %s1089_s8 }
  0x3d   :  { %p968_p13 = scmp.ne.s32.totalorder %s1089_s8, %s967_s28  ;;  %p973_p1 = scmp.lt.s32.totalorder %s967_s28, %s967_s28 }
  0x3f   :  { %p974_p2 = por %p973_p1, %p972_p0 }
  0x41   :  { %p975_p3 = pnand %p974_p2, %p968_p13 }
  0x43   :  { %978 = shalt.err (!%p975_p3)
}
  0x44   :  { %67 = dma.hbm_to_vmem [thread:$0]  %s1155_s5, 2048, %s1089_s8, [#allocation9], %s1013_s1, %s1013_s1, %s1014_s25  }
  0x45   :  { %1001 = dma.done.wait [#allocation3], 128  }
  0x46   :  { %1002 = vsyncadd [#allocation3], 4294967168 }
  0x47   :  { %1003 = dma.done.wait [#allocation6], 6144  }
  0x48   :  { %1004 = vsyncadd [#allocation6], 4294961152 }
  0x49   :  { %1005 = dma.done.wait [#allocation9], 2048  }
  0x4a   :  { %1006 = vsyncadd [#allocation9], 4294965248  ;;  %v1017_v0 = vmov 0   ;;  %v798_v1 = vld [vmem:[#allocation5 + $0x4] ss:$8 sps:$4 sm:$0xff]   ;;  %v822_v27 = vld [vmem:[#allocation2] sm:$0xff]   ;;  %v103_v61 = vlaneseq }
  0x4b   :  { %231 = vmatprep.mubr.bf16.mxu0 %v1017_v0  ;;  %v800_v2 = vld [vmem:[#allocation5] ss:$8 sps:$4 sm:$0xff]   ;;  %199 = vmatprep.subr.bf16.mxu0 %v798_v1  ;;  %v801_v3 = vld [vmem:[#allocation5 + $0x14] ss:$8 sps:$4 sm:$0xff]   ;;  %v803_v4 = vld [vmem:[#allocation5 + $0x10] ss:$8 sps:$4 sm:$0xff]  }
  0x4c   :  { %200 = vmatpush1.bf16.msra.mxu0 %v800_v2  ;;  %v804_v5 = vld [vmem:[#allocation5 + $0x24] ss:$8 sps:$4 sm:$0xff]   ;;  %v806_v6 = vld [vmem:[#allocation5 + $0x20] ss:$8 sps:$4 sm:$0xff]   ;;  %v807_v7 = vld [vmem:[#allocation5 + $0x34] ss:$8 sps:$4 sm:$0xff]  }
  0x4d   :  { %201 = vmatprep.subr.bf16.mxu0 %v801_v3  ;;  %v809_v8 = vld [vmem:[#allocation5 + $0x30] ss:$8 sps:$4 sm:$0xff]   ;;  %v810_v9 = vld [vmem:[#allocation5 + $0x44] ss:$8 sps:$4 sm:$0xff]   ;;  %v825_v11 = vld [vmem:[#allocation7] ss:$8 sps:$4 sm:$0xff]  }
  0x4e   :  { %v823_v10 = vld [vmem:[#allocation7 + $0x4] ss:$8 sps:$4 sm:$0xff]   ;;  %v826_v12 = vld [vmem:[#allocation7 + $0x14] ss:$8 sps:$4 sm:$0xff]   ;;  %v812_v13 = vld [vmem:[#allocation5 + $0x40] ss:$8 sps:$4 sm:$0xff]  }
  0x4f   :  { %452 = vmatprep.subr.bf16.mxu1 %v823_v10  ;;  %v828_v14 = vld [vmem:[#allocation7 + $0x10] ss:$8 sps:$4 sm:$0xff]   ;;  %v813_v15 = vld [vmem:[#allocation5 + $0x54] ss:$8 sps:$4 sm:$0xff]   ;;  %v829_v16 = vld [vmem:[#allocation7 + $0x24] ss:$8 sps:$4 sm:$0xff]  }
  0x50   :  { %202 = vmatpush1.bf16.msra.mxu0 %v803_v4  ;;  %453 = vmatpush1.bf16.msra.mxu1 %v825_v11  ;;  %v815_v17 = vld [vmem:[#allocation5 + $0x50] ss:$8 sps:$4 sm:$0xff]   ;;  %v831_v18 = vld [vmem:[#allocation7 + $0x20] ss:$8 sps:$4 sm:$0xff]   ;;  %v816_v19 = vld [vmem:[#allocation5 + $0x64] ss:$8 sps:$4 sm:$0xff]  }
  0x51   :  { %203 = vmatprep.subr.bf16.mxu0 %v804_v5  ;;  %454 = vmatprep.subr.bf16.mxu1 %v826_v12  ;;  %v832_v20 = vld [vmem:[#allocation7 + $0x34] ss:$8 sps:$4 sm:$0xff]   ;;  %v818_v21 = vld [vmem:[#allocation5 + $0x60] ss:$8 sps:$4 sm:$0xff]   ;;  %v834_v22 = vld [vmem:[#allocation7 + $0x30] ss:$8 sps:$4 sm:$0xff]  }
  0x52   :  { %v819_v23 = vld [vmem:[#allocation5 + $0x74] ss:$8 sps:$4 sm:$0xff]   ;;  %v835_v24 = vld [vmem:[#allocation7 + $0x44] ss:$8 sps:$4 sm:$0xff]   ;;  %v821_v25 = vld [vmem:[#allocation5 + $0x70] ss:$8 sps:$4 sm:$0xff]  }
  0x53   :  { %v837_v26 = vld [vmem:[#allocation7 + $0x40] ss:$8 sps:$4 sm:$0xff]   ;;  %v838_v28 = vld [vmem:[#allocation7 + $0x54] ss:$8 sps:$4 sm:$0xff]   ;;  %v840_v29 = vld [vmem:[#allocation7 + $0x50] ss:$8 sps:$4 sm:$0xff]  }
  0x54   :  { %204 = vmatpush1.bf16.msra.mxu0 %v806_v6  ;;  %455 = vmatpush1.bf16.msra.mxu1 %v828_v14  ;;  %v841_v30 = vld [vmem:[#allocation7 + $0x64] ss:$8 sps:$4 sm:$0xff]   ;;  %v843_v31 = vld [vmem:[#allocation7 + $0x60] ss:$8 sps:$4 sm:$0xff]   ;;  %v844_v32 = vld [vmem:[#allocation7 + $0x74] ss:$8 sps:$4 sm:$0xff]  }
  0x55   :  { %205 = vmatprep.subr.bf16.mxu0 %v807_v7  ;;  %456 = vmatprep.subr.bf16.mxu1 %v829_v16  ;;  %v846_v33 = vld [vmem:[#allocation7 + $0x70] ss:$8 sps:$4 sm:$0xff]   ;;  %v847_v34 = vld [vmem:[#allocation7 + $0x84] ss:$8 sps:$4 sm:$0xff]   ;;  %v849_v35 = vld [vmem:[#allocation7 + $0x80] ss:$8 sps:$4 sm:$0xff]  }
  0x56   :  { %v850_v36 = vld [vmem:[#allocation7 + $0x94] ss:$8 sps:$4 sm:$0xff]   ;;  %v852_v37 = vld [vmem:[#allocation7 + $0x90] ss:$8 sps:$4 sm:$0xff]   ;;  %v853_v38 = vld [vmem:[#allocation7 + $0xa4] ss:$8 sps:$4 sm:$0xff]  }
  0x57   :  { %v855_v39 = vld [vmem:[#allocation7 + $0xa0] ss:$8 sps:$4 sm:$0xff]   ;;  %v856_v40 = vld [vmem:[#allocation7 + $0xb4] ss:$8 sps:$4 sm:$0xff]   ;;  %v858_v41 = vld [vmem:[#allocation7 + $0xb0] ss:$8 sps:$4 sm:$0xff]  }
  0x58   :  { %206 = vmatpush1.bf16.msra.mxu0 %v809_v8  ;;  %457 = vmatpush1.bf16.msra.mxu1 %v831_v18  ;;  %v859_v42 = vld [vmem:[#allocation7 + $0xc4] ss:$8 sps:$4 sm:$0xff]   ;;  %v861_v43 = vld [vmem:[#allocation7 + $0xc0] ss:$8 sps:$4 sm:$0xff]   ;;  %v862_v44 = vld [vmem:[#allocation7 + $0xd4] ss:$8 sps:$4 sm:$0xff]  }
  0x59   :  { %207 = vmatprep.subr.bf16.mxu0 %v810_v9  ;;  %458 = vmatprep.subr.bf16.mxu1 %v832_v20  ;;  %v864_v45 = vld [vmem:[#allocation7 + $0xd0] ss:$8 sps:$4 sm:$0xff]   ;;  %v865_v46 = vld [vmem:[#allocation7 + $0xe4] ss:$8 sps:$4 sm:$0xff]   ;;  %v867_v47 = vld [vmem:[#allocation7 + $0xe0] ss:$8 sps:$4 sm:$0xff]  }
  0x5a   :  { %v868_v48 = vld [vmem:[#allocation7 + $0xf4] ss:$8 sps:$4 sm:$0xff]   ;;  %v870_v49 = vld [vmem:[#allocation7 + $0xf0] ss:$8 sps:$4 sm:$0xff]   ;;  %v871_v50 = vld [vmem:[#allocation8 + $0x40] sm:$0xff]   ;;  %v104_v62 = vshrl.u32 %v103_v61, 7 }
  0x5b   :  { %v872_v51 = vld [vmem:[#allocation8] sm:$0xff]   ;;  %v873_v52 = vld [vmem:[#allocation8 + $0x48] sm:$0xff]   ;;  %v875_v54 = vld [vmem:[#allocation8 + $0x50] sm:$0xff]   ;;  %s1018_s8 = smov [#allocation10]  }
  0x5c   :  { %208 = vmatpush1.bf16.msra.mxu0 %v812_v13  ;;  %459 = vmatpush1.bf16.msra.mxu1 %v834_v22  ;;  %v874_v53 = vld [vmem:[#allocation8 + $0x8] sm:$0xff]   ;;  %v876_v55 = vld [vmem:[#allocation8 + $0x10] sm:$0xff]   ;;  %v877_v56 = vld [vmem:[#allocation8 + $0x58] sm:$0xff]   ;;  %v105_v63 = vsub.s32 0, %v104_v62  ;;  %v109_v1 = vsub.s32 1, %v104_v62  ;;  %s686_s9 = sshll.u32 %s1018_s8, 4  ;;  %s687_s9 = int_to_ptr.vmem [resolvable:$true] %s686_s9 }
  0x5d   :  { %209 = vmatprep.subr.bf16.mxu0 %v813_v15  ;;  %460 = vmatprep.subr.bf16.mxu1 %v835_v24  ;;  %v878_v57 = vld [vmem:[#allocation8 + $0x18] sm:$0xff]   ;;  %v879_v58 = vld [vmem:[#allocation8 + $0x60] sm:$0xff]   ;;  %v881_v60 = vld [vmem:[#allocation8 + $0x68] sm:$0xff]   ;;  %s979_s10 = scalar_lea.vmem %s687_s9, 256  ;;  %p984_p5 = scmp.lt.s32.totalorder %s687_s9, %s687_s9 }
  0x5e   :  { %v880_v59 = vld [vmem:[#allocation8 + $0x20] sm:$0xff]   ;;  %v101_v0 = vld [vmem:[%s1152_s2] sm:$0x3]  ;;  %v882_v18 = vld [vmem:[#allocation8 + $0x28] sm:$0xff]   ;;  %p980_p4 = scmp.ne.s32.totalorder %s687_s9, %s979_s10  ;;  %p985_p6 = scmp.lt.s32.totalorder %s979_s10, %s979_s10 }
  0x5f   :  { %v106_v2 = vrot.slane %v101_v0, %v105_v63  ;;  %v110_v3 = vrot.slane %v101_v0, %v109_v1  ;;  %v884_v20 = vld [vmem:[#allocation8 + $0x30] sm:$0xff]   ;;  %v886_v22 = vld [vmem:[#allocation8 + $0x38] sm:$0xff]  }
  0x60   :  { %210 = vmatpush1.bf16.msra.mxu0 %v815_v17  ;;  %461 = vmatpush1.bf16.msra.mxu1 %v837_v26  ;;  %p986_p7 = por %p985_p6, %p984_p5 }
  0x61   :  { %211 = vmatprep.subr.bf16.mxu0 %v816_v19  ;;  %462 = vmatprep.subr.bf16.mxu1 %v838_v28  ;;  %v883_v19 = vld [vmem:[#allocation8 + $0x70] sm:$0xff]  }
  0x62   :  { %p987_p8 = pnand %p986_p7, %p980_p4 }
  0x64   :  { %212 = vmatpush1.bf16.msra.mxu0 %v818_v21  ;;  %463 = vmatpush1.bf16.msra.mxu1 %v840_v29  ;;  %v885_v21 = vld [vmem:[#allocation8 + $0x78] sm:$0xff]  }
  0x65   :  { %213 = vmatprep.subr.bf16.mxu0 %v819_v23  ;;  %464 = vmatprep.subr.bf16.mxu1 %v841_v30  ;;  %v280_v23 = vld [vmem:[%s1154_s4] sm:$0x3] }
  0x66   :  { %v285_v24 = vrot.slane %v280_v23, %v105_v63 }
  0x68   :  { %214 = vmatpush1.bf16.msra.mxu0 %v821_v25  ;;  %465 = vmatpush1.bf16.msra.mxu1 %v843_v31  ;;  %v289_v25 = vrot.slane %v280_v23, %v109_v1 }
  0x69   :  { %466 = vmatprep.subr.bf16.mxu1 %v844_v32  ;;  %766 = vmatprep.subr.bf16.mxu0 %v871_v50 }
  0x6b   :  { %232 = vmatmul.mubr.bf16.vlgmr.msra.gmra.mrb[0].mxu0 %v822_v27 }
  0x6c   :  { %467 = vmatpush1.bf16.msra.mxu1 %v846_v33  ;;  %767 = vmatpush3.bf16.msra.mxu0 %v872_v51 }
  0x6d   :  { %468 = vmatprep.subr.bf16.mxu1 %v847_v34  ;;  %768 = vmatprep.subr.bf16.mxu0 %v873_v52 }
  0x70   :  { %469 = vmatpush1.bf16.msra.mxu1 %v849_v35  ;;  %769 = vmatpush3.bf16.msra.mxu0 %v874_v53 }
  0x71   :  { %470 = vmatprep.subr.bf16.mxu1 %v850_v36  ;;  %770 = vmatprep.subr.bf16.mxu0 %v875_v54 }
  0x74   :  { %471 = vmatpush1.bf16.msra.mxu1 %v852_v37  ;;  %771 = vmatpush3.bf16.msra.mxu0 %v876_v55 }
  0x75   :  { %472 = vmatprep.subr.bf16.mxu1 %v853_v38  ;;  %772 = vmatprep.subr.bf16.mxu0 %v877_v56 }
  0x78   :  { %473 = vmatpush1.bf16.msra.mxu1 %v855_v39  ;;  %773 = vmatpush3.bf16.msra.mxu0 %v878_v57 }
  0x79   :  { %474 = vmatprep.subr.bf16.mxu1 %v856_v40  ;;  %774 = vmatprep.subr.bf16.mxu0 %v879_v58 }
  0x7c   :  { %475 = vmatpush1.bf16.msra.mxu1 %v858_v41  ;;  %775 = vmatpush3.bf16.msra.mxu0 %v880_v59  ;;  %v749_v41 = vld [vmem:[%s1156_s6] ss:$0 sm:$0xff] }
  0x7d   :  { %476 = vmatprep.subr.bf16.mxu1 %v859_v42  ;;  %776 = vmatprep.subr.bf16.mxu0 %v881_v60 }
  0x80   :  { %477 = vmatpush1.bf16.msra.mxu1 %v861_v43  ;;  %777 = vmatpush3.bf16.msra.mxu0 %v882_v18 }
  0x81   :  { %478 = vmatprep.subr.bf16.mxu1 %v862_v44  ;;  %778 = vmatprep.subr.bf16.mxu0 %v883_v19 }
  0x84   :  { %479 = vmatpush1.bf16.msra.mxu1 %v864_v45  ;;  %779 = vmatpush3.bf16.msra.mxu0 %v884_v20 }
  0x85   :  { %480 = vmatprep.subr.bf16.mxu1 %v865_v46  ;;  %780 = vmatprep.subr.bf16.mxu0 %v885_v21 }
  0x88   :  { %481 = vmatpush1.bf16.msra.mxu1 %v867_v47  ;;  %781 = vmatpush3.bf16.msra.mxu0 %v886_v22 }
  0x89   :  { %482 = vmatprep.subr.bf16.mxu1 %v868_v48 }
  0x8c   :  { %483 = vmatpush1.bf16.msra.mxu1 %v870_v49 }
 0x13e   :  { %v233_v4 = vpop.f32.mrb[0].mxu0 }
 0x13f   :  { %v234_v5 = vadd.f32 %v233_v4, %v106_v2  ;;  %v235_v6 = vpop.f32.mrb[1].mxu0 }
 0x140   :  { %v236_v7 = vadd.f32 %v235_v6, %v110_v3  ;;  %v237_v8 = vpop.f32.mrb[2].mxu0 }
 0x141   :  { %v238_v9 = vadd.f32 %v237_v8, %v106_v2  ;;  %v239_v10 = vpop.f32.mrb[3].mxu0  ;;  %v242_v12 = vmax.f32 %v234_v5, 0.0 }
 0x142   :  { %v240_v11 = vadd.f32 %v239_v10, %v110_v3  ;;  %v243_v14 = vmax.f32 %v236_v7, 0.0 }
 0x143   :  { %v244_v13 = vmax.f32 %v238_v9, 0.0 }
 0x144   :  { %v245_v15 = vmax.f32 %v240_v11, 0.0 }
 0x145   :  { %v246_v16 = vpack.c.bf16 %v244_v13, %v242_v12 }
 0x146   :  { %v247_v17 = vpack.c.bf16 %v245_v15, %v243_v14 }
 0x148   :  { %484 = vmatprep.mubr.bf16.mxu1 %v247_v17 }
 0x149   :  { %485 = vmatmul.mubr.bf16.vlgmr.msra.gmra.mrb[0].mxu1 %v246_v16 }
 0x21c   :  { %v486_v26 = vpop.f32.mrb[0].mxu1 }
 0x21d   :  { %v487_v27 = vadd.f32 %v486_v26, %v285_v24  ;;  %v488_v28 = vpop.f32.mrb[1].mxu1 }
 0x21e   :  { %v489_v29 = vadd.f32 %v488_v28, %v289_v25  ;;  %v490_v30 = vpop.f32.mrb[2].mxu1 }
 0x21f   :  { %v491_v31 = vadd.f32 %v490_v30, %v285_v24  ;;  %v492_v32 = vpop.f32.mrb[3].mxu1  ;;  %v495_v34 = vmax.f32 %v487_v27, 0.0 }
 0x220   :  { %v493_v33 = vadd.f32 %v492_v32, %v289_v25  ;;  %v496_v36 = vmax.f32 %v489_v29, 0.0 }
 0x221   :  { %v497_v35 = vmax.f32 %v491_v31, 0.0 }
 0x222   :  { %v498_v37 = vmax.f32 %v493_v33, 0.0 }
 0x223   :  { %v499_v38 = vpack.c.bf16 %v497_v35, %v495_v34 }
 0x224   :  { %v500_v39 = vpack.c.bf16 %v498_v37, %v496_v36 }
 0x226   :  { %668 = vmatprep.mubr.bf16.mxu0 %v500_v39 }
 0x227   :  { %669 = vmatmul.mubr.bf16.vlgmr.msra.gmra.mrb[4].mxu0 %v499_v38 }
 0x2fa   :  { %v782_v40 = vpop.f32.mrb[4].mxu0 }
 0x2fb   :  { %v783_v42 = vpop.f32.mrb[5].mxu0 }
 0x2fc   :  { %v784_v43 = vadd.f32 %v783_v42, %v782_v40  ;;  %v785_v44 = vpop.f32.mrb[6].mxu0 }
 0x2fd   :  { %v786_v45 = vpop.f32.mrb[7].mxu0 }
 0x2fe   :  { %v671_v46 = vadd.f32 %v784_v43, %v749_v41  ;;  %v787_v47 = vadd.f32 %v786_v45, %v785_v44 }
 0x300   :  { %887 = vtanh.f32 %v671_v46  ;;  %v674_v48 = vadd.f32 %v787_v47, %v749_v41 }
 0x302   :  { %889 = vtanh.f32 %v674_v48 }
 0x30a   :  { %v888_v49 = vpop.eup %887 }
 0x30b   :  { %679 = vst [vmem:[#allocation10] sm:$0xff] %v888_v49 }
 0x30c   :  { %v890_v50 = vpop.eup %889 }
 0x30d   :  { %680 = vst [vmem:[#allocation10 + $0x8] sm:$0xff] %v890_v50 }
 0x30e   :  { %990 = shalt.err (!%p987_p8)
}
 0x30f   :  { %s991_s14 = scalar_lea.hbm %s1157_s7, 256 }
 0x310   :  { %p992_p9 = scmp.ne.s32.totalorder %s1157_s7, %s991_s14  ;;  %p995_p10 = scmp.lt.u32.totalorder %s991_s14, %s1157_s7 }
 0x312   :  { %p997_p11 = pnand %p995_p10, %p992_p9 }
 0x314   :  { %1000 = shalt.err (!%p997_p11)
}
 0x315   :  { %692 = dma.vmem_to_hbm [thread:$0]  %s687_s9, 256, %s1157_s7, [#allocation4], %s1010_s11, %s1010_s11, %s1011_s12  }
 0x316   :  { %1007 = dma.done.wait [#allocation4], 256  }
 0x317   :  { %1008 = vsyncadd [#allocation4], 4294967040 }
 0x318   :  { %696 = vsyncpa [#allocation3], 1 }
 0x319   :  { %697 = vsyncpa [#allocation6], 1 }
 0x31a   :  { %698 = vsyncpa [#allocation9], 1 }
 0x31b   :  { %699 = vsyncpa [#allocation4], 1 }

</bundles_post_ra>
